<compile_context>
chip_gen: v6e
topology: v6e:2x2x1
jax: 0.10.0
libtpu: 0.0.40
codegen_flags: <defaults>
</compile_context>

<pallas_src>
import jax
import jax.numpy as jnp
import numpy as np
from jax.experimental import pallas as pl
from jax.experimental.pallas import tpu as pltpu

VMEM_SPEC = pl.BlockSpec(memory_space=pltpu.MemorySpace.VMEM)
LANE = 128
BN_EPS = 1e-5


def _round_up(v, m):
    return (v + m - 1) // m * m


def _pad2d(a, rows, cols):
    return jnp.pad(a, ((0, rows - a.shape[0]), (0, cols - a.shape[1])))


# ------------------------------------------------------------------ fused kernel
def _graph_encoder_kernel(x_ref, ea_ref, inc_ref, pool_ref,
                          we_ref, be_ref, w1_ref, b1_ref, gamma_ref, beta_ref,
                          w2_ref, b2_ref, wo1_ref, bo1_ref, wo2_ref, bo2_ref,
                          o_ref):
    """Fused GraphEncoder forward:
       for each layer: edge_lin -> GINEConv(Linear-BN-ReLU-Linear) -> dropout(0) -> ReLU
       then scatter-mean over graphs -> out_lin (Linear-ReLU-Linear).

    All matmul operands are bf16 (incidence 0/1 values are exact in bf16);
    accumulation and BatchNorm / bias arithmetic are f32.
    """
    f32 = jnp.float32
    bf16 = jnp.bfloat16
    n_nodes = x_ref.shape[0]
    inv_n = 1.0 / n_nodes

    # Loaded once, reused by every layer (stay resident in VMEM/vregs).
    ea = ea_ref[...]           # (E, DE)  bf16, lane-padded edge features
    a_src = inc_ref[0]         # (E, N)   bf16 one-hot(src)  -- gather
    a_dst = inc_ref[1]         # (E, N)   bf16 one-hot(dst)  -- scatter-add
    x = x_ref[...]             # (N, D)   f32 running node features

    # TODO(synk): for large graphs replace the dense one-hot incidence matmuls
    # (O(E*N*F) flops, (E,N) memory) with an index-driven gather/scatter via
    # PrefetchScalarGridSpec; the MXU trick only pays off for small graphs.
    num_layers = we_ref.shape[0]
    # Statically unrolled over the (small) layer count; weights are stacked on
    # the leading axis so everything arrives in a single pallas_call.
    for l in range(num_layers):
        # edge_lins[l](edge_attr)
        eat = jnp.dot(ea, we_ref[l], preferred_element_type=f32) + be_ref[l]       # (E, D)
        # GINE message: ReLU(x_j + e); gather x_j via one-hot src incidence (MXU)
        x_src = jnp.dot(a_src, x.astype(bf16), preferred_element_type=f32)         # (E, D)
        msg = jnp.maximum(x_src + eat, 0.0).astype(bf16)
        # scatter-add to destination nodes: contract over E via dimension_numbers
        # (no transposed copy of the incidence matrix is materialized).
        agg = jax.lax.dot_general(a_dst, msg, (((0,), (0,)), ((), ())),
                                  preferred_element_type=f32)                      # (N, D)
        h = x + agg                                        # (1 + eps) * x_i + aggr, eps = 0
        # GINE nn = MLP: Linear -> BatchNorm1d (training-mode batch stats) -> ReLU -> Linear
        h1 = jnp.dot(h.astype(bf16), w1_ref[l], preferred_element_type=f32) + b1_ref[l]
        # single-pass BN statistics (biased variance, as PyTorch BN uses in training)
        mean = jnp.sum(h1, axis=0, keepdims=True) * inv_n
        var = jnp.sum(h1 * h1, axis=0, keepdims=True) * inv_n - mean * mean
        h1 = (h1 - mean) * jax.lax.rsqrt(var + BN_EPS) * gamma_ref[l] + beta_ref[l]
        h1 = jnp.maximum(h1, 0.0)
        h2 = jnp.dot(h1.astype(bf16), w2_ref[l], preferred_element_type=f32) + b2_ref[l]
        # TODO(synk): F.dropout with p > 0 in training mode needs RNG; dropout=0.0 -> identity.
        x = jnp.maximum(h2, 0.0)                           # self.act (ReLU)

    # scatter(x, batch, reduce='mean') + out_lin, fused (no HBM round-trip of x)
    g = jnp.dot(pool_ref[...], x, preferred_element_type=f32)                      # (G, D)
    h = jnp.maximum(
        jnp.dot(g.astype(bf16), wo1_ref[...], preferred_element_type=f32) + bo1_ref[...],
        0.0)
    o_ref[...] = jnp.dot(h.astype(bf16), wo2_ref[...],
                         preferred_element_type=f32) + bo2_ref[...]                # (G, DO)


# ------------------------------------------------------------------ packing / wrapper
def pack_inputs_and_params(x, edge_attr, src, dst, batch, num_graphs,
                           layer_params, out_params):
    """Pad feature dims to the 128-lane width, stack per-layer weights, cast MXU
    operands to bf16.  The node count N is NOT padded so BatchNorm statistics
    over nodes are unchanged."""
    n, f_node = x.shape
    e, f_edge = edge_attr.shape
    hid = layer_params[0]["w1"].shape[1]
    out_dim = out_params["wo2"].shape[1]

    d = _round_up(max(f_node, hid), LANE)     # padded node/hidden feature dim
    de = _round_up(f_edge, LANE)              # padded edge feature dim
    do = _round_up(out_dim, LANE)             # padded (lane-dense) output dim

    # ---- data ----
    x_p = _pad2d(x, n, d)                                              # f32 (N, D)
    ea_p = _pad2d(edge_attr, e, de).astype(jnp.bfloat16)               # (E, DE)
    a_src = jax.nn.one_hot(src, n, dtype=jnp.bfloat16)                 # (E, N)
    a_dst = jax.nn.one_hot(dst, n, dtype=jnp.bfloat16)                 # (E, N)
    inc = jnp.stack([a_src, a_dst])                                    # (2, E, N) single operand
    pool = jax.nn.one_hot(batch, num_graphs, dtype=jnp.float32).T      # (G, N)
    pool = pool / jnp.maximum(pool.sum(axis=1, keepdims=True), 1.0)    # scatter mean

    # ---- stacked, padded per-layer parameters ----
    we_s = jnp.stack([_pad2d(p["we"], de, d) for p in layer_params]).astype(jnp.bfloat16)
    w1_s = jnp.stack([_pad2d(p["w1"], d, d) for p in layer_params]).astype(jnp.bfloat16)
    w2_s = jnp.stack([_pad2d(p["w2"], d, d) for p in layer_params]).astype(jnp.bfloat16)
    be_s = jnp.stack([_pad2d(p["be"], 1, d) for p in layer_params])
    b1_s = jnp.stack([_pad2d(p["b1"], 1, d) for p in layer_params])
    gm_s = jnp.stack([_pad2d(p["gamma"], 1, d) for p in layer_params])
    bt_s = jnp.stack([_pad2d(p["beta"], 1, d) for p in layer_params])
    b2_s = jnp.stack([_pad2d(p["b2"], 1, d) for p in layer_params])

    wo1_p = _pad2d(out_params["wo1"], d, do).astype(jnp.bfloat16)
    bo1_p = _pad2d(out_params["bo1"], 1, do)
    wo2_p = _pad2d(out_params["wo2"], do, do).astype(jnp.bfloat16)
    bo2_p = _pad2d(out_params["bo2"], 1, do)

    operands = (x_p, ea_p, inc, pool,
                we_s, be_s, w1_s, b1_s, gm_s, bt_s, w2_s, b2_s,
                wo1_p, bo1_p, wo2_p, bo2_p)
    return operands, out_dim, do


def graph_encoder_forward(operands, num_graphs, out_dim, padded_out_dim):
    """Single fused pallas_call for the whole GraphEncoder forward pass."""
    out_padded = pl.pallas_call(
        _graph_encoder_kernel,
        out_shape=jax.ShapeDtypeStruct((num_graphs, padded_out_dim), jnp.float32),
        in_specs=[VMEM_SPEC] * len(operands),
        out_specs=VMEM_SPEC,
    )(*operands)
    return out_padded[:, :out_dim]


# ------------------------------------------------------------------ references (pure JAX)
def graph_encoder_reference_f32(x, edge_attr, src, dst, batch, num_graphs,
                                layer_params, out_params):
    """Straight f32 transcription of the PyTorch module (semantic reference)."""
    n = x.shape[0]
    a_src = jax.nn.one_hot(src, n, dtype=jnp.float32)
    a_dst = jax.nn.one_hot(dst, n, dtype=jnp.float32)
    pool = jax.nn.one_hot(batch, num_graphs, dtype=jnp.float32).T
    pool = pool / jnp.maximum(pool.sum(axis=1, keepdims=True), 1.0)
    for p in layer_params:
        eat = edge_attr @ p["we"] + p["be"]
        msg = jnp.maximum(a_src @ x + eat, 0.0)
        h = x + a_dst.T @ msg
        h1 = h @ p["w1"] + p["b1"]
        mean = jnp.mean(h1, axis=0, keepdims=True)
        var = jnp.mean((h1 - mean) ** 2, axis=0, keepdims=True)
        h1 = (h1 - mean) / jnp.sqrt(var + BN_EPS) * p["gamma"] + p["beta"]
        h1 = jnp.maximum(h1, 0.0)
        x = jnp.maximum(h1 @ p["w2"] + p["b2"], 0.0)
    g = pool @ x
    h = jnp.maximum(g @ out_params["wo1"] + out_params["bo1"], 0.0)
    return h @ out_params["wo2"] + out_params["bo2"]


def graph_encoder_reference_bf16(x, edge_attr, src, dst, batch, num_graphs,
                                 layer_params, out_params):
    """Matched-precision reference: same bf16 matmul operands / f32 accumulation
    strategy as the kernel, written independently on the unpadded arrays."""
    bf16, f32 = jnp.bfloat16, jnp.float32
    n = x.shape[0]
    inv_n = 1.0 / n
    a_src = jax.nn.one_hot(src, n, dtype=bf16)
    a_dst = jax.nn.one_hot(dst, n, dtype=bf16)
    pool = jax.nn.one_hot(batch, num_graphs, dtype=f32).T
    pool = pool / jnp.maximum(pool.sum(axis=1, keepdims=True), 1.0)
    ea = edge_attr.astype(bf16)
    for p in layer_params:
        eat = jnp.dot(ea, p["we"].astype(bf16), preferred_element_type=f32) + p["be"]
        x_src = jnp.dot(a_src, x.astype(bf16), preferred_element_type=f32)
        msg = jnp.maximum(x_src + eat, 0.0).astype(bf16)
        agg = jax.lax.dot_general(a_dst, msg, (((0,), (0,)), ((), ())),
                                  preferred_element_type=f32)
        h = x + agg
        h1 = jnp.dot(h.astype(bf16), p["w1"].astype(bf16), preferred_element_type=f32) + p["b1"]
        mean = jnp.sum(h1, axis=0, keepdims=True) * inv_n
        var = jnp.sum(h1 * h1, axis=0, keepdims=True) * inv_n - mean * mean
        h1 = (h1 - mean) * jax.lax.rsqrt(var + BN_EPS) * p["gamma"] + p["beta"]
        h1 = jnp.maximum(h1, 0.0)
        h2 = jnp.dot(h1.astype(bf16), p["w2"].astype(bf16), preferred_element_type=f32) + p["b2"]
        x = jnp.maximum(h2, 0.0)
    g = jnp.dot(pool, x, preferred_element_type=f32)
    h = jnp.maximum(jnp.dot(g.astype(bf16), out_params["wo1"].astype(bf16),
                            preferred_element_type=f32) + out_params["bo1"], 0.0)
    return jnp.dot(h.astype(bf16), out_params["wo2"].astype(bf16),
                   preferred_element_type=f32) + out_params["bo2"]


# ------------------------------------------------------------------ param init (deterministic)
def _linear_params(key, fan_in, fan_out):
    kw, kb = jax.random.split(key)
    bound = 1.0 / np.sqrt(fan_in)
    w = jax.random.uniform(kw, (fan_in, fan_out), jnp.float32, -bound, bound)
    b = jax.random.uniform(kb, (1, fan_out), jnp.float32, -bound, bound)
    return w, b


if __name__ == "__main__":
    # Hyperparameters (small, consistent with the module)
    N, E, G = 16, 32, 2                       # nodes, edges, graphs
    F_NODE, F_EDGE = 8, 4                     # num_node_features, num_edge_features
    N_LAYERS, HID, OUT = 2, 32, 16            # n_layers, hid_dim, out_dim (dropout = 0.0)

    key = jax.random.PRNGKey(0)
    keys = jax.random.split(key, 16)

    # ---- graph data ----
    x = jax.random.normal(keys[0], (N, F_NODE), jnp.float32)
    edge_attr = jax.random.normal(keys[1], (E, F_EDGE), jnp.float32)
    src = jax.random.randint(keys[2], (E,), 0, N)
    dst = jax.random.randint(keys[3], (E,), 0, N)
    batch = jnp.concatenate([jnp.zeros(N // 2, jnp.int32), jnp.ones(N - N // 2, jnp.int32)])

    # ---- parameters (unpadded, PyTorch-style init) ----
    layer_params = []
    kidx = 4
    for i in range(N_LAYERS):
        fin = F_NODE if i == 0 else HID
        we, be = _linear_params(keys[kidx + 0], F_EDGE, fin)   # edge_lins[i]
        w1, b1 = _linear_params(keys[kidx + 1], fin, HID)      # MLP Linear 1
        w2, b2 = _linear_params(keys[kidx + 2], HID, HID)      # MLP Linear 2
        layer_params.append(dict(
            we=we, be=be, w1=w1, b1=b1,
            gamma=jnp.ones((1, HID), jnp.float32),
            beta=jnp.zeros((1, HID), jnp.float32),
            w2=w2, b2=b2))
        kidx += 3
    wo1, bo1 = _linear_params(keys[kidx + 0], HID, OUT)
    wo2, bo2 = _linear_params(keys[kidx + 1], OUT, OUT)
    out_params = dict(wo1=wo1, bo1=bo1, wo2=wo2, bo2=bo2)

    # ---- pack (pad to lane width, stack per-layer weights, bf16 cast) & run ----
    operands, out_dim, padded_out_dim = pack_inputs_and_params(
        x, edge_attr, src, dst, batch, G, layer_params, out_params)
    out = graph_encoder_forward(operands, G, out_dim, padded_out_dim)
    out = jax.block_until_ready(out)
    assert out.shape == (G, OUT)

    # ---- correctness: matched-precision reference (tight) + f32 semantic reference (loose,
    #      accounts for the deliberate bf16-matmul / f32-accumulation precision choice) ----
    ref_bf16 = graph_encoder_reference_bf16(x, edge_attr, src, dst, batch, G,
                                            layer_params, out_params)
    ref_f32 = graph_encoder_reference_f32(x, edge_attr, src, dst, batch, G,
                                          layer_params, out_params)
    np.testing.assert_allclose(np.asarray(out), np.asarray(ref_bf16), rtol=2e-3, atol=2e-3)
    np.testing.assert_allclose(np.asarray(out), np.asarray(ref_f32), rtol=5e-2, atol=5e-2)
    print("KERNEL_OK")
</pallas_src>

<mosaic_0001>
module attributes {stable_mosaic.version = 11 : i64} {
  func.func @_graph_encoder_kernel(%arg0: memref<16x128xf32, #tpu.memory_space<vmem>>, %arg1: memref<32x128xbf16, #tpu.memory_space<vmem>>, %arg2: memref<2x32x16xbf16, #tpu.memory_space<vmem>>, %arg3: memref<2x16xf32, #tpu.memory_space<vmem>>, %arg4: memref<2x128x128xbf16, #tpu.memory_space<vmem>>, %arg5: memref<2x1x128xf32, #tpu.memory_space<vmem>>, %arg6: memref<2x128x128xbf16, #tpu.memory_space<vmem>>, %arg7: memref<2x1x128xf32, #tpu.memory_space<vmem>>, %arg8: memref<2x1x128xf32, #tpu.memory_space<vmem>>, %arg9: memref<2x1x128xf32, #tpu.memory_space<vmem>>, %arg10: memref<2x128x128xbf16, #tpu.memory_space<vmem>>, %arg11: memref<2x1x128xf32, #tpu.memory_space<vmem>>, %arg12: memref<128x128xbf16, #tpu.memory_space<vmem>>, %arg13: memref<1x128xf32, #tpu.memory_space<vmem>>, %arg14: memref<128x128xbf16, #tpu.memory_space<vmem>>, %arg15: memref<1x128xf32, #tpu.memory_space<vmem>>, %arg16: memref<2x128xf32, #tpu.memory_space<vmem>>) attributes {dimension_semantics = [], scalar_prefetch = 0 : i64, scratch_operands = 0 : i64, tpu.core_type = #tpu.core_type<tc>} {
    %c0 = arith.constant 0 : index
    %c0_0 = arith.constant 0 : index
    %0 = vector.load %arg1[%c0, %c0_0] : memref<32x128xbf16, #tpu.memory_space<vmem>>, vector<32x128xbf16>
    %c0_1 = arith.constant 0 : index
    %c0_2 = arith.constant 0 : index
    %c0_3 = arith.constant 0 : index
    %1 = vector.load %arg2[%c0_1, %c0_2, %c0_3] : memref<2x32x16xbf16, #tpu.memory_space<vmem>>, vector<1x32x16xbf16>
    %2 = vector.shape_cast %1 : vector<1x32x16xbf16> to vector<32x16xbf16>
    %c1 = arith.constant 1 : index
    %c0_4 = arith.constant 0 : index
    %c0_5 = arith.constant 0 : index
    %3 = vector.load %arg2[%c1, %c0_4, %c0_5] : memref<2x32x16xbf16, #tpu.memory_space<vmem>>, vector<1x32x16xbf16>
    %4 = vector.shape_cast %3 : vector<1x32x16xbf16> to vector<32x16xbf16>
    %c0_6 = arith.constant 0 : index
    %c0_7 = arith.constant 0 : index
    %5 = vector.load %arg0[%c0_6, %c0_7] : memref<16x128xf32, #tpu.memory_space<vmem>>, vector<16x128xf32>
    %c0_8 = arith.constant 0 : index
    %c0_9 = arith.constant 0 : index
    %c0_10 = arith.constant 0 : index
    %6 = vector.load %arg4[%c0_8, %c0_9, %c0_10] : memref<2x128x128xbf16, #tpu.memory_space<vmem>>, vector<1x128x128xbf16>
    %7 = vector.shape_cast %6 : vector<1x128x128xbf16> to vector<128x128xbf16>
    %cst = arith.constant dense<0.000000e+00> : vector<32x128xf32>
    %8 = tpu.matmul %0, %7, %cst {dimension_numbers = #tpu.dot_dimension_numbers<[1], [0], [0], [1], [0, 0, 1, 1], [], []>} : vector<32x128xbf16>, vector<128x128xbf16>, vector<32x128xf32> -> vector<32x128xf32>
    %c0_11 = arith.constant 0 : index
    %c0_12 = arith.constant 0 : index
    %c0_13 = arith.constant 0 : index
    %9 = vector.load %arg5[%c0_11, %c0_12, %c0_13] : memref<2x1x128xf32, #tpu.memory_space<vmem>>, vector<1x1x128xf32>
    %10 = vector.shape_cast %9 : vector<1x1x128xf32> to vector<1x128xf32>
    %11 = vector.broadcast %10 : vector<1x128xf32> to vector<32x128xf32>
    %12 = arith.addf %8, %11 : vector<32x128xf32>
    %13 = arith.truncf %5 : vector<16x128xf32> to vector<16x128xbf16>
    %cst_14 = arith.constant dense<0.000000e+00> : vector<32x128xf32>
    %14 = tpu.matmul %2, %13, %cst_14 {dimension_numbers = #tpu.dot_dimension_numbers<[1], [0], [0], [1], [0, 0, 1, 1], [], []>} : vector<32x16xbf16>, vector<16x128xbf16>, vector<32x128xf32> -> vector<32x128xf32>
    %15 = arith.addf %14, %12 : vector<32x128xf32>
    %cst_15 = arith.constant 0.000000e+00 : f32
    %16 = vector.broadcast %cst_15 : f32 to vector<32x128xf32>
    %17 = arith.maximumf %15, %16 : vector<32x128xf32>
    %18 = arith.truncf %17 : vector<32x128xf32> to vector<32x128xbf16>
    %cst_16 = arith.constant dense<0.000000e+00> : vector<16x128xf32>
    %19 = tpu.matmul %4, %18, %cst_16 {dimension_numbers = #tpu.dot_dimension_numbers<[0], [0], [1], [1], [0, 1, 1, 1], [], []>} : vector<32x16xbf16>, vector<32x128xbf16>, vector<16x128xf32> -> vector<16x128xf32>
    %20 = arith.addf %5, %19 : vector<16x128xf32>
    %21 = arith.truncf %20 : vector<16x128xf32> to vector<16x128xbf16>
    %c0_17 = arith.constant 0 : index
    %c0_18 = arith.constant 0 : index
    %c0_19 = arith.constant 0 : index
    %22 = vector.load %arg6[%c0_17, %c0_18, %c0_19] : memref<2x128x128xbf16, #tpu.memory_space<vmem>>, vector<1x128x128xbf16>
    %23 = vector.shape_cast %22 : vector<1x128x128xbf16> to vector<128x128xbf16>
    %cst_20 = arith.constant dense<0.000000e+00> : vector<16x128xf32>
    %24 = tpu.matmul %21, %23, %cst_20 {dimension_numbers = #tpu.dot_dimension_numbers<[1], [0], [0], [1], [0, 0, 1, 1], [], []>} : vector<16x128xbf16>, vector<128x128xbf16>, vector<16x128xf32> -> vector<16x128xf32>
    %c0_21 = arith.constant 0 : index
    %c0_22 = arith.constant 0 : index
    %c0_23 = arith.constant 0 : index
    %25 = vector.load %arg7[%c0_21, %c0_22, %c0_23] : memref<2x1x128xf32, #tpu.memory_space<vmem>>, vector<1x1x128xf32>
    %26 = vector.shape_cast %25 : vector<1x1x128xf32> to vector<1x128xf32>
    %27 = vector.broadcast %26 : vector<1x128xf32> to vector<16x128xf32>
    %28 = arith.addf %24, %27 : vector<16x128xf32>
    %cst_24 = arith.constant dense<0.000000e+00> : vector<128xf32>
    %29 = vector.multi_reduction <add>, %28, %cst_24 [0] : vector<16x128xf32> to vector<128xf32>
    %30 = vector.shape_cast %29 : vector<128xf32> to vector<1x128xf32>
    %cst_25 = arith.constant 6.250000e-02 : f32
    %31 = vector.broadcast %cst_25 : f32 to vector<1x128xf32>
    %32 = arith.mulf %30, %31 : vector<1x128xf32>
    %33 = arith.mulf %28, %28 : vector<16x128xf32>
    %cst_26 = arith.constant dense<0.000000e+00> : vector<128xf32>
    %34 = vector.multi_reduction <add>, %33, %cst_26 [0] : vector<16x128xf32> to vector<128xf32>
    %35 = vector.shape_cast %34 : vector<128xf32> to vector<1x128xf32>
    %cst_27 = arith.constant 6.250000e-02 : f32
    %36 = vector.broadcast %cst_27 : f32 to vector<1x128xf32>
    %37 = arith.mulf %35, %36 : vector<1x128xf32>
    %38 = arith.mulf %32, %32 : vector<1x128xf32>
    %39 = arith.subf %37, %38 : vector<1x128xf32>
    %40 = vector.broadcast %32 : vector<1x128xf32> to vector<16x128xf32>
    %41 = arith.subf %28, %40 : vector<16x128xf32>
    %cst_28 = arith.constant 9.99999974E-6 : f32
    %42 = vector.broadcast %cst_28 : f32 to vector<1x128xf32>
    %43 = arith.addf %39, %42 : vector<1x128xf32>
    %44 = math.rsqrt %43 : vector<1x128xf32>
    %45 = vector.broadcast %44 : vector<1x128xf32> to vector<16x128xf32>
    %46 = arith.mulf %41, %45 : vector<16x128xf32>
    %c0_29 = arith.constant 0 : index
    %c0_30 = arith.constant 0 : index
    %c0_31 = arith.constant 0 : index
    %47 = vector.load %arg8[%c0_29, %c0_30, %c0_31] : memref<2x1x128xf32, #tpu.memory_space<vmem>>, vector<1x1x128xf32>
    %48 = vector.shape_cast %47 : vector<1x1x128xf32> to vector<1x128xf32>
    %49 = vector.broadcast %48 : vector<1x128xf32> to vector<16x128xf32>
    %50 = arith.mulf %46, %49 : vector<16x128xf32>
    %c0_32 = arith.constant 0 : index
    %c0_33 = arith.constant 0 : index
    %c0_34 = arith.constant 0 : index
    %51 = vector.load %arg9[%c0_32, %c0_33, %c0_34] : memref<2x1x128xf32, #tpu.memory_space<vmem>>, vector<1x1x128xf32>
    %52 = vector.shape_cast %51 : vector<1x1x128xf32> to vector<1x128xf32>
    %53 = vector.broadcast %52 : vector<1x128xf32> to vector<16x128xf32>
    %54 = arith.addf %50, %53 : vector<16x128xf32>
    %cst_35 = arith.constant 0.000000e+00 : f32
    %55 = vector.broadcast %cst_35 : f32 to vector<16x128xf32>
    %56 = arith.maximumf %54, %55 : vector<16x128xf32>
    %57 = arith.truncf %56 : vector<16x128xf32> to vector<16x128xbf16>
    %c0_36 = arith.constant 0 : index
    %c0_37 = arith.constant 0 : index
    %c0_38 = arith.constant 0 : index
    %58 = vector.load %arg10[%c0_36, %c0_37, %c0_38] : memref<2x128x128xbf16, #tpu.memory_space<vmem>>, vector<1x128x128xbf16>
    %59 = vector.shape_cast %58 : vector<1x128x128xbf16> to vector<128x128xbf16>
    %cst_39 = arith.constant dense<0.000000e+00> : vector<16x128xf32>
    %60 = tpu.matmul %57, %59, %cst_39 {dimension_numbers = #tpu.dot_dimension_numbers<[1], [0], [0], [1], [0, 0, 1, 1], [], []>} : vector<16x128xbf16>, vector<128x128xbf16>, vector<16x128xf32> -> vector<16x128xf32>
    %c0_40 = arith.constant 0 : index
    %c0_41 = arith.constant 0 : index
    %c0_42 = arith.constant 0 : index
    %61 = vector.load %arg11[%c0_40, %c0_41, %c0_42] : memref<2x1x128xf32, #tpu.memory_space<vmem>>, vector<1x1x128xf32>
    %62 = vector.shape_cast %61 : vector<1x1x128xf32> to vector<1x128xf32>
    %63 = vector.broadcast %62 : vector<1x128xf32> to vector<16x128xf32>
    %64 = arith.addf %60, %63 : vector<16x128xf32>
    %cst_43 = arith.constant 0.000000e+00 : f32
    %65 = vector.broadcast %cst_43 : f32 to vector<16x128xf32>
    %66 = arith.maximumf %64, %65 : vector<16x128xf32>
    %c1_44 = arith.constant 1 : index
    %c0_45 = arith.constant 0 : index
    %c0_46 = arith.constant 0 : index
    %67 = vector.load %arg4[%c1_44, %c0_45, %c0_46] : memref<2x128x128xbf16, #tpu.memory_space<vmem>>, vector<1x128x128xbf16>
    %68 = vector.shape_cast %67 : vector<1x128x128xbf16> to vector<128x128xbf16>
    %cst_47 = arith.constant dense<0.000000e+00> : vector<32x128xf32>
    %69 = tpu.matmul %0, %68, %cst_47 {dimension_numbers = #tpu.dot_dimension_numbers<[1], [0], [0], [1], [0, 0, 1, 1], [], []>} : vector<32x128xbf16>, vector<128x128xbf16>, vector<32x128xf32> -> vector<32x128xf32>
    %c1_48 = arith.constant 1 : index
    %c0_49 = arith.constant 0 : index
    %c0_50 = arith.constant 0 : index
    %70 = vector.load %arg5[%c1_48, %c0_49, %c0_50] : memref<2x1x128xf32, #tpu.memory_space<vmem>>, vector<1x1x128xf32>
    %71 = vector.shape_cast %70 : vector<1x1x128xf32> to vector<1x128xf32>
    %72 = vector.broadcast %71 : vector<1x128xf32> to vector<32x128xf32>
    %73 = arith.addf %69, %72 : vector<32x128xf32>
    %74 = arith.truncf %66 : vector<16x128xf32> to vector<16x128xbf16>
    %cst_51 = arith.constant dense<0.000000e+00> : vector<32x128xf32>
    %75 = tpu.matmul %2, %74, %cst_51 {dimension_numbers = #tpu.dot_dimension_numbers<[1], [0], [0], [1], [0, 0, 1, 1], [], []>} : vector<32x16xbf16>, vector<16x128xbf16>, vector<32x128xf32> -> vector<32x128xf32>
    %76 = arith.addf %75, %73 : vector<32x128xf32>
    %cst_52 = arith.constant 0.000000e+00 : f32
    %77 = vector.broadcast %cst_52 : f32 to vector<32x128xf32>
    %78 = arith.maximumf %76, %77 : vector<32x128xf32>
    %79 = arith.truncf %78 : vector<32x128xf32> to vector<32x128xbf16>
    %cst_53 = arith.constant dense<0.000000e+00> : vector<16x128xf32>
    %80 = tpu.matmul %4, %79, %cst_53 {dimension_numbers = #tpu.dot_dimension_numbers<[0], [0], [1], [1], [0, 1, 1, 1], [], []>} : vector<32x16xbf16>, vector<32x128xbf16>, vector<16x128xf32> -> vector<16x128xf32>
    %81 = arith.addf %66, %80 : vector<16x128xf32>
    %82 = arith.truncf %81 : vector<16x128xf32> to vector<16x128xbf16>
    %c1_54 = arith.constant 1 : index
    %c0_55 = arith.constant 0 : index
    %c0_56 = arith.constant 0 : index
    %83 = vector.load %arg6[%c1_54, %c0_55, %c0_56] : memref<2x128x128xbf16, #tpu.memory_space<vmem>>, vector<1x128x128xbf16>
    %84 = vector.shape_cast %83 : vector<1x128x128xbf16> to vector<128x128xbf16>
    %cst_57 = arith.constant dense<0.000000e+00> : vector<16x128xf32>
    %85 = tpu.matmul %82, %84, %cst_57 {dimension_numbers = #tpu.dot_dimension_numbers<[1], [0], [0], [1], [0, 0, 1, 1], [], []>} : vector<16x128xbf16>, vector<128x128xbf16>, vector<16x128xf32> -> vector<16x128xf32>
    %c1_58 = arith.constant 1 : index
    %c0_59 = arith.constant 0 : index
    %c0_60 = arith.constant 0 : index
    %86 = vector.load %arg7[%c1_58, %c0_59, %c0_60] : memref<2x1x128xf32, #tpu.memory_space<vmem>>, vector<1x1x128xf32>
    %87 = vector.shape_cast %86 : vector<1x1x128xf32> to vector<1x128xf32>
    %88 = vector.broadcast %87 : vector<1x128xf32> to vector<16x128xf32>
    %89 = arith.addf %85, %88 : vector<16x128xf32>
    %cst_61 = arith.constant dense<0.000000e+00> : vector<128xf32>
    %90 = vector.multi_reduction <add>, %89, %cst_61 [0] : vector<16x128xf32> to vector<128xf32>
    %91 = vector.shape_cast %90 : vector<128xf32> to vector<1x128xf32>
    %cst_62 = arith.constant 6.250000e-02 : f32
    %92 = vector.broadcast %cst_62 : f32 to vector<1x128xf32>
    %93 = arith.mulf %91, %92 : vector<1x128xf32>
    %94 = arith.mulf %89, %89 : vector<16x128xf32>
    %cst_63 = arith.constant dense<0.000000e+00> : vector<128xf32>
    %95 = vector.multi_reduction <add>, %94, %cst_63 [0] : vector<16x128xf32> to vector<128xf32>
    %96 = vector.shape_cast %95 : vector<128xf32> to vector<1x128xf32>
    %cst_64 = arith.constant 6.250000e-02 : f32
    %97 = vector.broadcast %cst_64 : f32 to vector<1x128xf32>
    %98 = arith.mulf %96, %97 : vector<1x128xf32>
    %99 = arith.mulf %93, %93 : vector<1x128xf32>
    %100 = arith.subf %98, %99 : vector<1x128xf32>
    %101 = vector.broadcast %93 : vector<1x128xf32> to vector<16x128xf32>
    %102 = arith.subf %89, %101 : vector<16x128xf32>
    %cst_65 = arith.constant 9.99999974E-6 : f32
    %103 = vector.broadcast %cst_65 : f32 to vector<1x128xf32>
    %104 = arith.addf %100, %103 : vector<1x128xf32>
    %105 = math.rsqrt %104 : vector<1x128xf32>
    %106 = vector.broadcast %105 : vector<1x128xf32> to vector<16x128xf32>
    %107 = arith.mulf %102, %106 : vector<16x128xf32>
    %c1_66 = arith.constant 1 : index
    %c0_67 = arith.constant 0 : index
    %c0_68 = arith.constant 0 : index
    %108 = vector.load %arg8[%c1_66, %c0_67, %c0_68] : memref<2x1x128xf32, #tpu.memory_space<vmem>>, vector<1x1x128xf32>
    %109 = vector.shape_cast %108 : vector<1x1x128xf32> to vector<1x128xf32>
    %110 = vector.broadcast %109 : vector<1x128xf32> to vector<16x128xf32>
    %111 = arith.mulf %107, %110 : vector<16x128xf32>
    %c1_69 = arith.constant 1 : index
    %c0_70 = arith.constant 0 : index
    %c0_71 = arith.constant 0 : index
    %112 = vector.load %arg9[%c1_69, %c0_70, %c0_71] : memref<2x1x128xf32, #tpu.memory_space<vmem>>, vector<1x1x128xf32>
    %113 = vector.shape_cast %112 : vector<1x1x128xf32> to vector<1x128xf32>
    %114 = vector.broadcast %113 : vector<1x128xf32> to vector<16x128xf32>
    %115 = arith.addf %111, %114 : vector<16x128xf32>
    %cst_72 = arith.constant 0.000000e+00 : f32
    %116 = vector.broadcast %cst_72 : f32 to vector<16x128xf32>
    %117 = arith.maximumf %115, %116 : vector<16x128xf32>
    %118 = arith.truncf %117 : vector<16x128xf32> to vector<16x128xbf16>
    %c1_73 = arith.constant 1 : index
    %c0_74 = arith.constant 0 : index
    %c0_75 = arith.constant 0 : index
    %119 = vector.load %arg10[%c1_73, %c0_74, %c0_75] : memref<2x128x128xbf16, #tpu.memory_space<vmem>>, vector<1x128x128xbf16>
    %120 = vector.shape_cast %119 : vector<1x128x128xbf16> to vector<128x128xbf16>
    %cst_76 = arith.constant dense<0.000000e+00> : vector<16x128xf32>
    %121 = tpu.matmul %118, %120, %cst_76 {dimension_numbers = #tpu.dot_dimension_numbers<[1], [0], [0], [1], [0, 0, 1, 1], [], []>} : vector<16x128xbf16>, vector<128x128xbf16>, vector<16x128xf32> -> vector<16x128xf32>
    %c1_77 = arith.constant 1 : index
    %c0_78 = arith.constant 0 : index
    %c0_79 = arith.constant 0 : index
    %122 = vector.load %arg11[%c1_77, %c0_78, %c0_79] : memref<2x1x128xf32, #tpu.memory_space<vmem>>, vector<1x1x128xf32>
    %123 = vector.shape_cast %122 : vector<1x1x128xf32> to vector<1x128xf32>
    %124 = vector.broadcast %123 : vector<1x128xf32> to vector<16x128xf32>
    %125 = arith.addf %121, %124 : vector<16x128xf32>
    %cst_80 = arith.constant 0.000000e+00 : f32
    %126 = vector.broadcast %cst_80 : f32 to vector<16x128xf32>
    %127 = arith.maximumf %125, %126 : vector<16x128xf32>
    %c0_81 = arith.constant 0 : index
    %c0_82 = arith.constant 0 : index
    %128 = vector.load %arg3[%c0_81, %c0_82] : memref<2x16xf32, #tpu.memory_space<vmem>>, vector<2x16xf32>
    %cst_83 = arith.constant dense<0.000000e+00> : vector<2x128xf32>
    %129 = tpu.matmul %128, %127, %cst_83 {dimension_numbers = #tpu.dot_dimension_numbers<[1], [0], [0], [1], [0, 0, 1, 1], [], []>} : vector<2x16xf32>, vector<16x128xf32>, vector<2x128xf32> -> vector<2x128xf32>
    %130 = arith.truncf %129 : vector<2x128xf32> to vector<2x128xbf16>
    %c0_84 = arith.constant 0 : index
    %c0_85 = arith.constant 0 : index
    %131 = vector.load %arg12[%c0_84, %c0_85] : memref<128x128xbf16, #tpu.memory_space<vmem>>, vector<128x128xbf16>
    %cst_86 = arith.constant dense<0.000000e+00> : vector<2x128xf32>
    %132 = tpu.matmul %130, %131, %cst_86 {dimension_numbers = #tpu.dot_dimension_numbers<[1], [0], [0], [1], [0, 0, 1, 1], [], []>} : vector<2x128xbf16>, vector<128x128xbf16>, vector<2x128xf32> -> vector<2x128xf32>
    %c0_87 = arith.constant 0 : index
    %c0_88 = arith.constant 0 : index
    %133 = vector.load %arg13[%c0_87, %c0_88] : memref<1x128xf32, #tpu.memory_space<vmem>>, vector<1x128xf32>
    %134 = vector.broadcast %133 : vector<1x128xf32> to vector<2x128xf32>
    %135 = arith.addf %132, %134 : vector<2x128xf32>
    %cst_89 = arith.constant 0.000000e+00 : f32
    %136 = vector.broadcast %cst_89 : f32 to vector<2x128xf32>
    %137 = arith.maximumf %135, %136 : vector<2x128xf32>
    %138 = arith.truncf %137 : vector<2x128xf32> to vector<2x128xbf16>
    %c0_90 = arith.constant 0 : index
    %c0_91 = arith.constant 0 : index
    %139 = vector.load %arg14[%c0_90, %c0_91] : memref<128x128xbf16, #tpu.memory_space<vmem>>, vector<128x128xbf16>
    %cst_92 = arith.constant dense<0.000000e+00> : vector<2x128xf32>
    %140 = tpu.matmul %138, %139, %cst_92 {dimension_numbers = #tpu.dot_dimension_numbers<[1], [0], [0], [1], [0, 0, 1, 1], [], []>} : vector<2x128xbf16>, vector<128x128xbf16>, vector<2x128xf32> -> vector<2x128xf32>
    %c0_93 = arith.constant 0 : index
    %c0_94 = arith.constant 0 : index
    %141 = vector.load %arg15[%c0_93, %c0_94] : memref<1x128xf32, #tpu.memory_space<vmem>>, vector<1x128xf32>
    %142 = vector.broadcast %141 : vector<1x128xf32> to vector<2x128xf32>
    %143 = arith.addf %140, %142 : vector<2x128xf32>
    %c0_95 = arith.constant 0 : index
    %c0_96 = arith.constant 0 : index
    %144 = vector.load %arg16[%c0_95, %c0_96] : memref<2x128xf32, #tpu.memory_space<vmem>>, vector<2x128xf32>
    tpu.vector_store %arg16[%c0_95, %c0_96], %143 {strides = array<i32>} : memref<2x128xf32, #tpu.memory_space<vmem>>, vector<2x128xf32>,
    return
  }
}

</mosaic_0001>

<bundles_post_ra>
// kernel: tpu_custom_call.1
= control target key start
LH: loop header
LB: loop body
LE: loop exit
PB: predicated region body
PF: predicated region fallthrough
CT: control target
= control target key end

     0   :  { %s2623_s0 = inlined_call_operand.hbm [shape: f32[16,128], index: 0, kind: input, shape index: {}]   ;;  %s2624_s1 = inlined_call_operand.hbm [shape: bf16[32,128], index: 1, kind: input, shape index: {}]   ;;  %s2625_s2 = inlined_call_operand.vmem [shape: bf16[2,32,16], index: 2, kind: input, shape index: {}]   ;;  %s2626_s3 = inlined_call_operand.vmem [shape: f32[2,16], index: 3, kind: input, shape index: {}]   ;;  %s2627_s4 = inlined_call_operand.hbm [shape: bf16[2,128,128], index: 4, kind: input, shape index: {}]   ;;  %s2628_s5 = inlined_call_operand.vmem [shape: f32[2,1,128], index: 5, kind: input, shape index: {}]   ;;  %s2629_s6 = inlined_call_operand.hbm [shape: bf16[2,128,128], index: 6, kind: input, shape index: {}]   ;;  %s2630_s7 = inlined_call_operand.hbm [shape: f32[2,1,128], index: 7, kind: input, shape index: {}]   ;;  %s2631_s8 = inlined_call_operand.hbm [shape: f32[2,1,128], index: 8, kind: input, shape index: {}]   ;;  %s2632_s9 = inlined_call_operand.hbm [shape: f32[2,1,128], index: 9, kind: input, shape index: {}]   ;;  %s2633_s10 = inlined_call_operand.hbm [shape: bf16[2,128,128], index: 10, kind: input, shape index: {}]   ;;  %s2634_s11 = inlined_call_operand.hbm [shape: f32[2,1,128], index: 11, kind: input, shape index: {}]   ;;  %s2635_s12 = inlined_call_operand.vmem [shape: bf16[128,128], index: 12, kind: input, shape index: {}]   ;;  %s2636_s13 = inlined_call_operand.vmem [shape: f32[1,128], index: 13, kind: input, shape index: {}]   ;;  %s2637_s14 = inlined_call_operand.hbm [shape: bf16[128,128], index: 14, kind: input, shape index: {}]   ;;  %s2638_s15 = inlined_call_operand.vmem [shape: f32[1,128], index: 15, kind: input, shape index: {}]   ;;  %s2639_s16 = inlined_call_operand.hbm [shape: f32[2,128], index: 16, kind: output, shape index: {}]  }
   0x1   :  { %2640 = sst [smem:[#allocation27_spill]] %s2623_s0 }
   0x2   :  { %21 = vsyncpa [#allocation3], 0 }
   0x3   :  { %22 = vsyncpa [#allocation6], 0 }
   0x4   :  { %23 = vsyncpa [#allocation9], 0 }
   0x5   :  { %24 = vsyncpa [#allocation12], 0 }
   0x6   :  { %25 = vsyncpa [#allocation15], 0 }
   0x7   :  { %26 = vsyncpa [#allocation18], 0 }
   0x8   :  { %27 = vsyncpa [#allocation4], 0  ;;  %s2287_s21 = smov [#allocation5]  }
   0x9   :  { %s45_s22 = sshll.u32 %s2287_s21, 4  ;;  %s46_s22 = int_to_ptr.vmem [resolvable:$true] %s45_s22 }
   0xa   :  { %s2061_s23 = scalar_lea.vmem %s46_s22, 256  ;;  %p2066_p1 = scmp.lt.s32.totalorder %s46_s22, %s46_s22 }
   0xb   :  { %p2062_p0 = scmp.ne.s32.totalorder %s46_s22, %s2061_s23  ;;  %p2067_p2 = scmp.lt.s32.totalorder %s2061_s23, %s2061_s23 }
   0xd   :  { %p2068_p3 = por %p2067_p2, %p2066_p1 }
   0xf   :  { %p2069_p4 = pnand %p2068_p3, %p2062_p0 }
  0x11   :  { %2072 = shalt.err (!%p2069_p4)
}
  0x12   :  { %s2288_s24 = smov 64   ;;  %s2289_s25 = smov 4  }
  0x13   :  { %51 = dma.hbm_to_vmem [thread:$0]  %s2624_s1, 256, %s46_s22, [#allocation6], %s2288_s24, %s2288_s24, %s2289_s25  }
  0x14   :  { %s2290_s28 = smov [#allocation8]  }
  0x15   :  { %s75_s29 = sshll.u32 %s2290_s28, 4  ;;  %s76_s29 = int_to_ptr.vmem [resolvable:$true] %s75_s29 }
  0x16   :  { %s2081_s30 = scalar_lea.vmem %s76_s29, 2048  ;;  %p2086_p6 = scmp.lt.s32.totalorder %s76_s29, %s76_s29 }
  0x17   :  { %p2082_p5 = scmp.ne.s32.totalorder %s76_s29, %s2081_s30  ;;  %p2087_p7 = scmp.lt.s32.totalorder %s2081_s30, %s2081_s30 }
  0x19   :  { %p2088_p8 = por %p2087_p7, %p2086_p6 }
  0x1b   :  { %p2089_p9 = pnand %p2088_p8, %p2082_p5 }
  0x1d   :  { %2092 = shalt.err (!%p2089_p9)
}
  0x1e   :  { %81 = dma.hbm_to_vmem [thread:$0]  %s2629_s6, 2048, %s76_s29, [#allocation9], %s2288_s24, %s2288_s24, %s2289_s25  }
  0x1f   :  { %s2291_s18 = smov [#allocation11]   ;;  %s2292_s1 = smov [#allocation14]  }
  0x20   :  { %s99_s19 = sshll.u32 %s2291_s18, 4  ;;  %s123_s20 = sshll.u32 %s2292_s1, 4  ;;  %s100_s19 = int_to_ptr.vmem [resolvable:$true] %s99_s19  ;;  %s124_s20 = int_to_ptr.vmem [resolvable:$true] %s123_s20 }
  0x21   :  { %s2101_s21 = scalar_lea.vmem %s100_s19, 32  ;;  %p2106_p11 = scmp.lt.s32.totalorder %s100_s19, %s100_s19 }
  0x22   :  { %p2102_p10 = scmp.ne.s32.totalorder %s100_s19, %s2101_s21  ;;  %p2107_p12 = scmp.lt.s32.totalorder %s2101_s21, %s2101_s21 }
  0x24   :  { %p2108_p13 = por %p2107_p12, %p2106_p11 }
  0x26   :  { %p2109_p0 = pnand %p2108_p13, %p2102_p10 }
  0x28   :  { %2112 = shalt.err (!%p2109_p0)
}
  0x29   :  { %s2293_s22 = smov 16   ;;  %s2294_s23 = smov 1  }
  0x2a   :  { %105 = dma.hbm_to_vmem [thread:$0]  %s2631_s8, 32, %s100_s19, [#allocation12], %s2293_s22, %s2293_s22, %s2294_s23  }
  0x2b   :  { %s2121_s27 = scalar_lea.vmem %s124_s20, 2048  ;;  %p2126_p2 = scmp.lt.s32.totalorder %s124_s20, %s124_s20 }
  0x2c   :  { %p2122_p1 = scmp.ne.s32.totalorder %s124_s20, %s2121_s27  ;;  %p2127_p3 = scmp.lt.s32.totalorder %s2121_s27, %s2121_s27 }
  0x2e   :  { %p2128_p4 = por %p2127_p3, %p2126_p2 }
  0x30   :  { %p2129_p5 = pnand %p2128_p4, %p2122_p1 }
  0x32   :  { %2132 = shalt.err (!%p2129_p5)
}
  0x33   :  { %129 = dma.hbm_to_vmem [thread:$0]  %s2633_s10, 2048, %s124_s20, [#allocation15], %s2288_s24, %s2288_s24, %s2289_s25  }
  0x34   :  { %s2295_s30 = smov [#allocation2]  }
  0x35   :  { %s33_s0 = sshll.u32 %s2295_s30, 4  ;;  %s34_s0 = int_to_ptr.vmem [resolvable:$true] %s33_s0 }
  0x36   :  { %s2141_s17 = scalar_lea.vmem %s34_s0, 256  ;;  %p2146_p7 = scmp.lt.s32.totalorder %s34_s0, %s34_s0 }
  0x37   :  { %p2142_p6 = scmp.ne.s32.totalorder %s34_s0, %s2141_s17  ;;  %p2147_p8 = scmp.lt.s32.totalorder %s2141_s17, %s2141_s17 }
  0x39   :  { %p2148_p9 = por %p2147_p8, %p2146_p7 }
  0x3b   :  { %p2149_p10 = pnand %p2148_p9, %p2142_p6 }
  0x3d   :  { %2152 = shalt.err (!%p2149_p10)
}
  0x3e   :  { %s2296_s8 = smov 128   ;;  %s2297_s18 = smov 8  }
  0x3f   :  { %s2641_s21 = sld [smem:[#allocation27_spill]]  ;;  %s2298_s26 = smov [#allocation7]  }
  0x40   :  { %s61_s6 = sshll.u32 %s2298_s26, 4  ;;  %s2299_s10 = smov [#allocation10]   ;;  %s62_s6 = int_to_ptr.vmem [resolvable:$true] %s61_s6 }
  0x41   :  { %s87_s20 = sshll.u32 %s2299_s10, 4  ;;  %s2161_s27 = scalar_lea.vmem %s62_s6, 2048  ;;  %s88_s20 = int_to_ptr.vmem [resolvable:$true] %s87_s20 }
  0x42   :  { %p2162_p11 = scmp.ne.s32.totalorder %s62_s6, %s2161_s27  ;;  %p2166_p12 = scmp.lt.s32.totalorder %s62_s6, %s62_s6 }
  0x43   :  { %p2167_p13 = scmp.lt.s32.totalorder %s2161_s27, %s2161_s27 }
  0x45   :  { %39 = dma.hbm_to_vmem [thread:$0]  %s2641_s21, 256, %s34_s0, [#allocation3], %s2296_s8, %s2296_s8, %s2297_s18  }
  0x46   :  { %p2168_p0 = por %p2167_p13, %p2166_p12 }
  0x48   :  { %p2169_p1 = pnand %p2168_p0, %p2162_p11 }
  0x4a   :  { %2172 = shalt.err (!%p2169_p1)
}
  0x4b   :  { %67 = dma.hbm_to_vmem [thread:$0]  %s2627_s4, 2048, %s62_s6, [#allocation6], %s2288_s24, %s2288_s24, %s2289_s25  }
  0x4c   :  { %s2181_s30 = scalar_lea.vmem %s88_s20, 32  ;;  %p2186_p3 = scmp.lt.s32.totalorder %s88_s20, %s88_s20 }
  0x4d   :  { %p2182_p2 = scmp.ne.s32.totalorder %s88_s20, %s2181_s30  ;;  %p2187_p4 = scmp.lt.s32.totalorder %s2181_s30, %s2181_s30 }
  0x4f   :  { %p2188_p5 = por %p2187_p4, %p2186_p3 }
  0x51   :  { %p2189_p6 = pnand %p2188_p5, %p2182_p2 }
  0x53   :  { %2192 = shalt.err (!%p2189_p6)
}
  0x54   :  { %93 = dma.hbm_to_vmem [thread:$0]  %s2630_s7, 32, %s88_s20, [#allocation9], %s2293_s22, %s2293_s22, %s2294_s23  }
  0x55   :  { %s2300_s8 = smov [#allocation13]   ;;  %s2301_s19 = smov [#allocation16]  }
  0x56   :  { %s111_s18 = sshll.u32 %s2300_s8, 4  ;;  %s135_s4 = sshll.u32 %s2301_s19, 4  ;;  %s112_s18 = int_to_ptr.vmem [resolvable:$true] %s111_s18  ;;  %s136_s4 = int_to_ptr.vmem [resolvable:$true] %s135_s4 }
  0x57   :  { %s2201_s1 = scalar_lea.vmem %s112_s18, 32  ;;  %p2206_p8 = scmp.lt.s32.totalorder %s112_s18, %s112_s18 }
  0x58   :  { %p2202_p7 = scmp.ne.s32.totalorder %s112_s18, %s2201_s1  ;;  %p2207_p9 = scmp.lt.s32.totalorder %s2201_s1, %s2201_s1 }
  0x5a   :  { %p2208_p10 = por %p2207_p9, %p2206_p8 }
  0x5c   :  { %p2209_p11 = pnand %p2208_p10, %p2202_p7 }
  0x5e   :  { %2212 = shalt.err (!%p2209_p11)
}
  0x5f   :  { %117 = dma.hbm_to_vmem [thread:$0]  %s2632_s9, 32, %s112_s18, [#allocation12], %s2293_s22, %s2293_s22, %s2294_s23  }
  0x60   :  { %s2221_s7 = scalar_lea.vmem %s136_s4, 32  ;;  %p2226_p13 = scmp.lt.s32.totalorder %s136_s4, %s136_s4 }
  0x61   :  { %p2222_p12 = scmp.ne.s32.totalorder %s136_s4, %s2221_s7  ;;  %p2227_p0 = scmp.lt.s32.totalorder %s2221_s7, %s2221_s7 }
  0x63   :  { %p2228_p1 = por %p2227_p0, %p2226_p13 }
  0x65   :  { %p2229_p2 = pnand %p2228_p1, %p2222_p12 }
  0x67   :  { %2232 = shalt.err (!%p2229_p2)
}
  0x68   :  { %141 = dma.hbm_to_vmem [thread:$0]  %s2634_s11, 32, %s136_s4, [#allocation15], %s2293_s22, %s2293_s22, %s2294_s23  }
  0x69   :  { %s2302_s20 = smov [#allocation17]  }
  0x6a   :  { %s151_s27 = sshll.u32 %s2302_s20, 4  ;;  %s152_s27 = int_to_ptr.vmem [resolvable:$true] %s151_s27 }
  0x6b   :  { %s2241_s28 = scalar_lea.vmem %s152_s27, 1024  ;;  %p2246_p4 = scmp.lt.s32.totalorder %s152_s27, %s152_s27 }
  0x6c   :  { %p2242_p3 = scmp.ne.s32.totalorder %s152_s27, %s2241_s28  ;;  %p2247_p5 = scmp.lt.s32.totalorder %s2241_s28, %s2241_s28 }
  0x6e   :  { %p2248_p6 = por %p2247_p5, %p2246_p4 }
  0x70   :  { %p2249_p7 = pnand %p2248_p6, %p2242_p3 }
  0x72   :  { %2252 = shalt.err (!%p2249_p7)
}
  0x73   :  { %157 = dma.hbm_to_vmem [thread:$0]  %s2637_s14, 1024, %s152_s27, [#allocation18], %s2288_s24, %s2288_s24, %s2289_s25  }
  0x74   :  { %2273 = dma.done.wait [#allocation3], 256  }
  0x75   :  { %2274 = vsyncadd [#allocation3], 4294967040 }
  0x76   :  { %2275 = dma.done.wait [#allocation6], 2304  }
  0x77   :  { %2276 = vsyncadd [#allocation6], 4294964992 }
  0x78   :  { %2277 = dma.done.wait [#allocation9], 2080  }
  0x79   :  { %2278 = vsyncadd [#allocation9], 4294965216 }
  0x7a   :  { %2279 = dma.done.wait [#allocation12], 64  }
  0x7b   :  { %2280 = vsyncadd [#allocation12], 4294967232 }
  0x7c   :  { %2281 = dma.done.wait [#allocation15], 2080  }
  0x7d   :  { %2282 = vsyncadd [#allocation15], 4294965216 }
  0x7e   :  { %2283 = dma.done.wait [#allocation18], 1024  }
  0x7f   :  { %2284 = vsyncadd [#allocation18], 4294966272  ;;  %v1979_v0 = vld [vmem:[#allocation7 + $0x38] sm:$0xff]   ;;  %v1980_v1 = vld [vmem:[#allocation7 + $0x30] sm:$0xff]   ;;  %vm349_vm0 = vcmask 130048   ;;  %v2303_v17 = vmov 0.0  }
  0x80   :  { %1764 = vmatprep.subr.bf16.mxu0 %v1979_v0  ;;  %v1981_v2 = vld [vmem:[#allocation7 + $0x28] sm:$0xff]   ;;  %v1982_v3 = vld [vmem:[#allocation7 + $0x20] sm:$0xff]   ;;  %v2466_v9 = vld [vmem:[#allocation5] sm:$0xff]   ;;  %vm2304_vm1 = vmmov 0   ;;  %vm439_vm2 = vcmask 261120   ;;  %s2305_s30 = smov [#allocation19]  }
  0x81   :  { %1765 = vmatpush3.bf16.msra.mxu0 %v1979_v0  ;;  %v2448_v4 = vld [vmem:[#allocation2] sm:$0xff]  ;;  %v2450_v5 = vld [vmem:[#allocation2 + $0x8] sm:$0xff]  ;;  %v1983_v10 = vld [vmem:[#allocation7 + $0x18] sm:$0xff]   ;;  %1780 = vmatprep.mubr.bf16.mxu0 %v2466_v9  ;;  %s1567_s0 = sshll.u32 %s2305_s30, 4  ;;  %s1568_s0 = int_to_ptr.vmem [resolvable:$true] %s1567_s0 }
  0x82   :  { %1766 = vmatprep.subr.bf16.mxu0 %v1980_v1  ;;  %v338_v6 = vpack.c.bf16 %v2450_v5, %v2448_v4  ;;  %v2457_v7 = vld [vmem:[%s2625_s2] sm:$0xff]   ;;  %v2464_v8 = vld [vmem:[%s2625_s2 + $0x8] sm:$0xff]   ;;  %v1991_v11 = vld [vmem:[%s2625_s2 + $0x10] sm:$0xff]   ;;  %p2258_p9 = scmp.lt.s32.totalorder %s1568_s0, %s1568_s0 }
  0x83   :  { %1786 = vmatprep.mubr.msk.bf16.mxu1 %vm349_vm0, %v2457_v7  ;;  %v1984_v12 = vld [vmem:[#allocation7 + $0x10] sm:$0xff]   ;;  %423 = vxpose.xlu0.c.b16.start [1/2] (short) (narrow) %v1991_v11, 16  ;;  %v1992_v13 = vld [vmem:[%s2625_s2 + $0x18] sm:$0xff]   ;;  %v1985_v14 = vld [vmem:[#allocation7 + $0x8] sm:$0xff]  }
  0x84   :  { %1784 = vmatprep.subr.bf16.mxu1 %v338_v6  ;;  %v1987_v15 = vld [vmem:[#allocation7] sm:$0xff]   ;;  %v2477_v16 = vld [vmem:[#allocation5 + $0x8] sm:$0xff]   ;;  %v1994_v43 = vld [vmem:[#allocation8 + $0x30] sm:$0xff]  }
  0x85   :  { %1767 = vmatpush3.bf16.msra.mxu0 %v1980_v1  ;;  %1785 = vmatpush3.bf16.msra.mxu1 %v338_v6  ;;  %v1585_v19 = vld [vmem:[%s2628_s5] ss:$0 sm:$0xff]  ;;  %v1993_v42 = vld [vmem:[#allocation8 + $0x38] sm:$0xff]   ;;  %v1995_v44 = vld [vmem:[#allocation8 + $0x28] sm:$0xff]  }
  0x86   :  { %1768 = vmatprep.subr.bf16.mxu0 %v1981_v2  ;;  %1790 = vmatprep.subr.bf16.mxu1 %v2303_v17  ;;  %v1996_v45 = vld [vmem:[#allocation8 + $0x20] sm:$0xff]   ;;  %v1997_v46 = vld [vmem:[#allocation8 + $0x18] sm:$0xff]   ;;  %v1998_v47 = vld [vmem:[#allocation8 + $0x10] sm:$0xff]  }
  0x87   :  { %424 = vxpose.xlu0.c.b16.end [2/2] (short) (narrow) %v1992_v13, 16  ;;  %v1999_v48 = vld [vmem:[#allocation8 + $0x8] sm:$0xff]   ;;  %v2000_v49 = vld [vmem:[#allocation8] sm:$0xff]   ;;  %v2002_v58 = vld [vmem:[#allocation14 + $0x30] sm:$0xff]  }
  0x88   :  { %1787 = vmatmul.mubr.msk.bf16.vlgmr.msra.gmra.mxu1 %vm349_vm0, %v2464_v8  ;;  %v2001_v57 = vld [vmem:[#allocation14 + $0x38] sm:$0xff]   ;;  %v2003_v59 = vld [vmem:[#allocation14 + $0x28] sm:$0xff]   ;;  %v2004_v60 = vld [vmem:[#allocation14 + $0x20] sm:$0xff]  }
  0x89   :  { %1769 = vmatpush3.bf16.msra.mxu0 %v1981_v2  ;;  %1794 = vmatprep.mubr.msk.bf16.mxu1 %vm2304_vm1, %v2303_v17  ;;  %v2005_v61 = vld [vmem:[#allocation14 + $0x18] sm:$0xff]   ;;  %v2006_v62 = vld [vmem:[#allocation14 + $0x10] sm:$0xff]   ;;  %v2007_v63 = vld [vmem:[#allocation14 + $0x8] sm:$0xff]  }
  0x8a   :  { %1770 = vmatprep.subr.bf16.mxu0 %v1982_v3  ;;  %v2008_v0 = vld [vmem:[#allocation14] sm:$0xff]   ;;  %v2009_v1 = vld [vmem:[#allocation7 + $0x78] sm:$0xff]   ;;  %v2010_v2 = vld [vmem:[#allocation7 + $0x70] sm:$0xff]  }
  0x8b   :  { %v2014_v6 = vld [vmem:[#allocation7 + $0x50] sm:$0xff]  }
  0x8d   :  { %1771 = vmatpush3.bf16.msra.mxu0 %v1982_v3  ;;  %v2011_v3 = vld [vmem:[#allocation7 + $0x68] sm:$0xff]  }
  0x8e   :  { %1772 = vmatprep.subr.bf16.mxu0 %v1983_v10 }
  0x91   :  { %1773 = vmatpush3.bf16.msra.mxu0 %v1983_v10  ;;  %v1603_v10 = vld [vmem:[#allocation10] ss:$0 sm:$0xff] }
  0x92   :  { %1774 = vmatprep.subr.bf16.mxu0 %v1984_v12 }
  0x95   :  { %1775 = vmatpush3.bf16.msra.mxu0 %v1984_v12 }
  0x96   :  { %1776 = vmatprep.subr.bf16.mxu0 %v1985_v14 }
  0x99   :  { %1777 = vmatpush3.bf16.msra.mxu0 %v1985_v14 }
  0x9a   :  { %1778 = vmatprep.subr.bf16.mxu0 %v1987_v15 }
  0x9d   :  { %1779 = vmatpush3.bf16.msra.mxu0 %v1987_v15 }
  0x9e   :  { %1818 = vmatprep.subr.bf16.mxu0 %v2303_v17 }
  0xa0   :  { %1781 = vmatmul.mubr.bf16.vlgmr.msra.gmra.mxu0 %v2477_v16 }
  0xa1   :  { %1834 = vmatprep.mubr.msk.bf16.mxu0 %vm2304_vm1, %v2303_v17  ;;  %1819 = vmatpush3.bf16.msra.mxu0 %v2001_v57 }
  0xa2   :  { %1820 = vmatprep.subr.bf16.mxu0 %v2303_v17 }
  0xa5   :  { %1821 = vmatpush3.bf16.msra.mxu0 %v2002_v58 }
  0xa6   :  { %1822 = vmatprep.subr.bf16.mxu0 %v2303_v17 }
  0xa9   :  { %1823 = vmatpush3.bf16.msra.mxu0 %v2003_v59 }
  0xaa   :  { %1824 = vmatprep.subr.bf16.mxu0 %v2303_v17 }
  0xad   :  { %1825 = vmatpush3.bf16.msra.mxu0 %v2004_v60 }
  0xae   :  { %1826 = vmatprep.subr.bf16.mxu0 %v2303_v17 }
  0xb1   :  { %1827 = vmatpush3.bf16.msra.mxu0 %v2005_v61 }
  0xb2   :  { %1828 = vmatprep.subr.bf16.mxu0 %v2303_v17 }
  0xb5   :  { %1829 = vmatpush3.bf16.msra.mxu0 %v2006_v62 }
  0xb6   :  { %1830 = vmatprep.subr.bf16.mxu0 %v2303_v17 }
  0xb9   :  { %1831 = vmatpush3.bf16.msra.mxu0 %v2007_v63 }
  0xba   :  { %1832 = vmatprep.subr.bf16.mxu0 %v2303_v17 }
  0xbd   :  { %1833 = vmatpush3.bf16.msra.mxu0 %v2008_v0  ;;  %v2017_v0 = vld [vmem:[#allocation8 + $0x78] sm:$0xff]  }
  0xe5   :  { %v2490_v41 = vpop.trf.xlu0 }
 0x148   :  { %v1788_v18 = vpop.f32.mrf.mxu1 }
 0x14a   :  { %v390_v20 = vpop.f32.mrf.mxu1 }
 0x14c   :  { %v1789_v24 = vpop.f32.mrf.mxu1 }
 0x14e   :  { %v393_v32 = vpop.f32.mrf.mxu1 }
 0x160   :  { %v1782_v21 = vpop.f32.mrf.mxu0 }
 0x161   :  { %v332_v22 = vadd.f32 %v1782_v21, %v1585_v19 }
 0x162   :  { %v323_v23 = vpop.f32.mrf.mxu0 }
 0x163   :  { %v399_v26 = vadd.f32 %v1788_v18, %v332_v22  ;;  %v324_v27 = vadd.f32 %v1585_v19, %v323_v23 }
 0x164   :  { %v1783_v25 = vpop.f32.mrf.mxu0 }
 0x165   :  { %v335_v28 = vadd.f32 %v1783_v25, %v1585_v19  ;;  %v407_v33 = vmax.f32 %v399_v26, 0.0  ;;  %v391_v34 = vadd.f32 %v390_v20, %v324_v27 }
 0x166   :  { %v326_v29 = vpop.f32.mrf.mxu0 }
 0x167   :  { %v402_v30 = vadd.f32 %v1789_v24, %v335_v28  ;;  %v327_v31 = vadd.f32 %v1585_v19, %v326_v29  ;;  %v405_v39 = vmax.f32 %v391_v34, 0.0 }
 0x169   :  { %v408_v35 = vmax.f32 %v402_v30, 0.0  ;;  %v394_v36 = vadd.f32 %v393_v32, %v327_v31 }
 0x16b   :  { %v410_v37 = vpack.c.bf16 %v408_v35, %v407_v33  ;;  %v406_v38 = vmax.f32 %v394_v36, 0.0 }
 0x16d   :  { %1791 = vmatpush3.bf16.msra.mxu1 %v410_v37  ;;  %v409_v40 = vpack.c.bf16 %v406_v38, %v405_v39 }
 0x16e   :  { %1792 = vmatprep.subr.bf16.mxu1 %v2303_v17 }
 0x171   :  { %1793 = vmatpush3.bf16.msra.mxu1 %v409_v40 }
 0x172   :  { %1798 = vmatprep.subr.bf16.mxu1 %v2303_v17 }
 0x174   :  { %1795 = vmatmul.mubr.msk.bf16.vlgmr.msra.gmra.mxu1 %vm439_vm2, %v2490_v41 }
 0x175   :  { %1799 = vmatpush3.bf16.msra.mxu1 %v1993_v42  ;;  %1814 = vmatprep.mubr.msk.bf16.mxu1 %vm2304_vm1, %v2303_v17 }
 0x176   :  { %1800 = vmatprep.subr.bf16.mxu1 %v2303_v17 }
 0x179   :  { %1801 = vmatpush3.bf16.msra.mxu1 %v1994_v43 }
 0x17a   :  { %1802 = vmatprep.subr.bf16.mxu1 %v2303_v17 }
 0x17d   :  { %1803 = vmatpush3.bf16.msra.mxu1 %v1995_v44  ;;  %v1612_v44 = vld [vmem:[#allocation11] ss:$0 sm:$0xff] }
 0x17e   :  { %1804 = vmatprep.subr.bf16.mxu1 %v2303_v17 }
 0x181   :  { %1805 = vmatpush3.bf16.msra.mxu1 %v1996_v45 }
 0x182   :  { %1806 = vmatprep.subr.bf16.mxu1 %v2303_v17 }
 0x185   :  { %1807 = vmatpush3.bf16.msra.mxu1 %v1997_v46 }
 0x186   :  { %1808 = vmatprep.subr.bf16.mxu1 %v2303_v17 }
 0x189   :  { %1809 = vmatpush3.bf16.msra.mxu1 %v1998_v47  ;;  %v1613_v47 = vld [vmem:[#allocation13] ss:$0 sm:$0xff] }
 0x18a   :  { %1810 = vmatprep.subr.bf16.mxu1 %v2303_v17 }
 0x18d   :  { %1811 = vmatpush3.bf16.msra.mxu1 %v1999_v48 }
 0x18e   :  { %1812 = vmatprep.subr.bf16.mxu1 %v2303_v17 }
 0x191   :  { %1813 = vmatpush3.bf16.msra.mxu1 %v2000_v49 }
 0x192   :  { %1838 = vmatprep.subr.bf16.mxu1 %v2009_v1 }
 0x234   :  { %v477_v50 = vpop.f32.mrf.mxu1 }
 0x235   :  { %v484_v53 = vadd.f32 %v477_v50, %v2448_v4  ;;  %v2012_v4 = vld [vmem:[#allocation7 + $0x60] sm:$0xff]  }
 0x236   :  { %v1796_v51 = vpop.f32.mrf.mxu1 }
 0x238   :  { %v480_v52 = vpop.f32.mrf.mxu1 }
 0x239   :  { %v485_v54 = vadd.f32 %v480_v52, %v2450_v5  ;;  %v2013_v5 = vld [vmem:[#allocation7 + $0x58] sm:$0xff]  }
 0x23a   :  { %v1797_v55 = vpop.f32.mrf.mxu1 }
 0x23b   :  { %v486_v56 = vpack.c.bf16 %v485_v54, %v484_v53  ;;  %v2016_v55 = vld [vmem:[#allocation7 + $0x40] sm:$0xff]  }
 0x23d   :  { %1815 = vmatmul.mubr.bf16.vlgmr.msra.gmra.mxu1 %v486_v56  ;;  %v1614_v56 = vld [vmem:[#allocation16] ss:$0 sm:$0xff] }
 0x23e   :  { %1854 = vmatprep.mubr.bf16.mxu1 %v2466_v9  ;;  %1839 = vmatpush3.bf16.msra.mxu1 %v2009_v1  ;;  %v2015_v9 = vld [vmem:[#allocation7 + $0x48] sm:$0xff]   ;;  %v2018_v1 = vld [vmem:[#allocation8 + $0x70] sm:$0xff]  }
 0x23f   :  { %1840 = vmatprep.subr.bf16.mxu1 %v2010_v2 }
 0x242   :  { %1841 = vmatpush3.bf16.msra.mxu1 %v2010_v2  ;;  %v2019_v2 = vld [vmem:[#allocation8 + $0x68] sm:$0xff]  }
 0x243   :  { %1842 = vmatprep.subr.bf16.mxu1 %v2011_v3 }
 0x246   :  { %1843 = vmatpush3.bf16.msra.mxu1 %v2011_v3  ;;  %v2020_v3 = vld [vmem:[#allocation8 + $0x60] sm:$0xff]  }
 0x247   :  { %1844 = vmatprep.subr.bf16.mxu1 %v2012_v4 }
 0x24a   :  { %1845 = vmatpush3.bf16.msra.mxu1 %v2012_v4  ;;  %v2021_v4 = vld [vmem:[#allocation8 + $0x58] sm:$0xff]  }
 0x24b   :  { %1846 = vmatprep.subr.bf16.mxu1 %v2013_v5 }
 0x24e   :  { %1847 = vmatpush3.bf16.msra.mxu1 %v2013_v5 }
 0x24f   :  { %1848 = vmatprep.subr.bf16.mxu1 %v2014_v6 }
 0x252   :  { %1849 = vmatpush3.bf16.msra.mxu1 %v2014_v6 }
 0x253   :  { %1850 = vmatprep.subr.bf16.mxu1 %v2015_v9 }
 0x256   :  { %1851 = vmatpush3.bf16.msra.mxu1 %v2015_v9  ;;  %v1624_v9 = vld [vmem:[%s2628_s5 + $0x1] ss:$0 sm:$0xff] }
 0x257   :  { %1852 = vmatprep.subr.bf16.mxu1 %v2016_v55 }
 0x25a   :  { %1853 = vmatpush3.bf16.msra.mxu1 %v2016_v55 }
 0x25b   :  { %1872 = vmatprep.subr.bf16.mxu1 %v2303_v17 }
 0x25d   :  { %1855 = vmatmul.mubr.bf16.vlgmr.msra.gmra.mxu1 %v2477_v16 }
 0x25e   :  { %1888 = vmatprep.mubr.msk.bf16.mxu1 %vm2304_vm1, %v2303_v17  ;;  %1873 = vmatpush3.bf16.msra.mxu1 %v2017_v0 }
 0x25f   :  { %1874 = vmatprep.subr.bf16.mxu1 %v2303_v17 }
 0x262   :  { %1875 = vmatpush3.bf16.msra.mxu1 %v2018_v1 }
 0x263   :  { %1876 = vmatprep.subr.bf16.mxu1 %v2303_v17 }
 0x266   :  { %1877 = vmatpush3.bf16.msra.mxu1 %v2019_v2 }
 0x267   :  { %1878 = vmatprep.subr.bf16.mxu1 %v2303_v17 }
 0x26a   :  { %1879 = vmatpush3.bf16.msra.mxu1 %v2020_v3 }
 0x26b   :  { %1880 = vmatprep.subr.bf16.mxu1 %v2303_v17 }
 0x26e   :  { %1881 = vmatpush3.bf16.msra.mxu1 %v2021_v4 }
 0x26f   :  { %1882 = vmatprep.subr.bf16.mxu1 %v2303_v17 }
 0x2fd   :  { %v592_v11 = vpop.f32.mrf.mxu1 }
 0x2fe   :  { %v593_v13 = vadd.f32 %v1603_v10, %v592_v11 }
 0x2ff   :  { %v1816_v12 = vpop.f32.mrf.mxu1 }
 0x300   :  { %v607_v19 = vmul.f32 %v593_v13, %v593_v13 }
 0x301   :  { %v595_v14 = vpop.f32.mrf.mxu1 }
 0x302   :  { %v596_v15 = vadd.f32 %v1603_v10, %v595_v14 }
 0x303   :  { %v1817_v18 = vpop.f32.mrf.mxu1 }
 0x304   :  { %v599_v20 = vadd.f32 %v596_v15, %v593_v13  ;;  %v608_v21 = vmul.f32 %v596_v15, %v596_v15 }
 0x306   :  { %v600_v22 = vrot.slane %v599_v20, 4  ;;  %v609_v23 = vadd.f32 %v608_v21, %v607_v19 }
 0x308   :  { %v601_v24 = vadd.f32 %v600_v22, %v599_v20  ;;  %v610_v25 = vrot.slane %v609_v23, 4 }
 0x30a   :  { %v602_v26 = vrot.slane %v601_v24, 2  ;;  %v611_v27 = vadd.f32 %v610_v25, %v609_v23 }
 0x30c   :  { %v603_v28 = vadd.f32 %v602_v26, %v601_v24  ;;  %v612_v29 = vrot.slane %v611_v27, 2 }
 0x30e   :  { %v604_v30 = vrot.slane %v603_v28, 1  ;;  %v613_v31 = vadd.f32 %v612_v29, %v611_v27 }
 0x310   :  { %v605_v32 = vadd.f32 %v604_v30, %v603_v28  ;;  %v614_v33 = vrot.slane %v613_v31, 1 }
 0x312   :  { %v606_v34 = vmul.f32 0.0625, %v605_v32  ;;  %v615_v35 = vadd.f32 %v614_v33, %v613_v31  ;;  %v2023_v32 = vld [vmem:[#allocation8 + $0x48] sm:$0xff]   ;;  %v2024_v33 = vld [vmem:[#allocation8 + $0x40] sm:$0xff]  }
 0x314   :  { %v616_v36 = vmul.f32 0.0625, %v615_v35  ;;  %v617_v37 = vmul.f32 %v606_v34, %v606_v34  ;;  %v619_v40 = vsub.f32 %v593_v13, %v606_v34  ;;  %v620_v42 = vsub.f32 %v596_v15, %v606_v34 }
 0x316   :  { %v618_v38 = vsub.f32 %v616_v36, %v617_v37 }
 0x318   :  { %v621_v39 = vadd.f32 1e-05, %v618_v38 }
 0x31a   :  { %2049 = vrsqrt.f32 %v621_v39 }
 0x31d   :  { %v1856_v5 = vpop.f32.mrf.mxu1 }
 0x31e   :  { %v876_v11 = vadd.f32 %v1856_v5, %v1624_v9 }
 0x31f   :  { %v867_v6 = vpop.f32.mrf.mxu1 }
 0x320   :  { %v868_v20 = vadd.f32 %v1624_v9, %v867_v6 }
 0x321   :  { %v1857_v10 = vpop.f32.mrf.mxu1 }
 0x322   :  { %v879_v15 = vadd.f32 %v1857_v10, %v1624_v9 }
 0x323   :  { %v870_v13 = vpop.f32.mrf.mxu1 }
 0x324   :  { %v871_v21 = vadd.f32 %v1624_v9, %v870_v13 }
 0x327   :  { %v2050_v43 = vpop.eup %2049 }
 0x328   :  { %v623_v45 = vmul.f32 %v2050_v43, %v619_v40  ;;  %v624_v46 = vmul.f32 %v2050_v43, %v620_v42  ;;  %v2025_v40 = vld [vmem:[#allocation14 + $0x78] sm:$0xff]   ;;  %v2026_v42 = vld [vmem:[#allocation14 + $0x70] sm:$0xff]   ;;  %v2027_v43 = vld [vmem:[#allocation14 + $0x68] sm:$0xff]  }
 0x32a   :  { %v632_v48 = vmul.f32 %v1612_v44, %v623_v45  ;;  %v633_v49 = vmul.f32 %v1612_v44, %v624_v46  ;;  %v2028_v44 = vld [vmem:[#allocation14 + $0x60] sm:$0xff]   ;;  %v2029_v45 = vld [vmem:[#allocation14 + $0x58] sm:$0xff]   ;;  %v2030_v46 = vld [vmem:[#allocation14 + $0x50] sm:$0xff]  }
 0x32c   :  { %v641_v50 = vadd.f32 %v1613_v47, %v632_v48  ;;  %v642_v51 = vadd.f32 %v1613_v47, %v633_v49  ;;  %v2031_v47 = vld [vmem:[#allocation14 + $0x48] sm:$0xff]   ;;  %v2032_v48 = vld [vmem:[#allocation14 + $0x40] sm:$0xff]   ;;  %v1636_v49 = vld [vmem:[#allocation10 + $0x1] ss:$0 sm:$0xff] }
 0x32e   :  { %v643_v52 = vmax.f32 %v641_v50, 0.0  ;;  %v644_v53 = vmax.f32 %v642_v51, 0.0 }
 0x330   :  { %v645_v54 = vpack.c.bf16 %v644_v53, %v643_v52 }
 0x332   :  { %1835 = vmatmul.mubr.bf16.vlgmr.msra.gmra.mxu0 %v645_v54 }
 0x333   :  { %1860 = vmatprep.mubr.msk.bf16.mxu0 %vm349_vm0, %v2457_v7 }
 0x3f2   :  { %v751_v57 = vpop.f32.mrf.mxu0 }
 0x3f3   :  { %v2520_v59 = vadd.f32 %v1614_v56, %v751_v57 }
 0x3f4   :  { %v1836_v58 = vpop.f32.mrf.mxu0 }
 0x3f5   :  { %v758_v7 = vmax.f32 %v2520_v59, 0.0 }
 0x3f6   :  { %v754_v60 = vpop.f32.mrf.mxu0 }
 0x3f7   :  { %v2522_v61 = vadd.f32 %v1614_v56, %v754_v60 }
 0x3f8   :  { %v1837_v62 = vpop.f32.mrf.mxu0 }
 0x3f9   :  { %v759_v63 = vmax.f32 %v2522_v61, 0.0 }
 0x3fb   :  { %v882_v16 = vpack.c.bf16 %v759_v63, %v758_v7 }
 0x3fd   :  { %1858 = vmatprep.subr.bf16.mxu0 %v882_v16 }
 0x3fe   :  { %1859 = vmatpush3.bf16.msra.mxu0 %v882_v16 }
 0x3ff   :  { %1864 = vmatprep.subr.bf16.mxu0 %v2303_v17 }
 0x401   :  { %1861 = vmatmul.mubr.msk.bf16.vlgmr.msra.gmra.mxu0 %vm349_vm0, %v2464_v8  ;;  %v2022_v8 = vld [vmem:[#allocation8 + $0x50] sm:$0xff]  }
 0x402   :  { %1868 = vmatprep.mubr.msk.bf16.mxu0 %vm2304_vm1, %v2303_v17  ;;  %1883 = vmatpush3.bf16.msra.mxu1 %v2022_v8 }
 0x403   :  { %1884 = vmatprep.subr.bf16.mxu1 %v2303_v17 }
 0x406   :  { %1885 = vmatpush3.bf16.msra.mxu1 %v2023_v32  ;;  %v2037_v32 = vld [vmem:[%s2635_s12 + $0x18] sm:$0xff]  }
 0x407   :  { %1886 = vmatprep.subr.bf16.mxu1 %v2303_v17 }
 0x40a   :  { %1887 = vmatpush3.bf16.msra.mxu1 %v2024_v33  ;;  %v2038_v33 = vld [vmem:[%s2635_s12 + $0x10] sm:$0xff]  }
 0x40b   :  { %1912 = vmatprep.subr.mxu1 %v2303_v17 }
 0x4c1   :  { %v1862_v12 = vpop.f32.mrf.mxu0 }
 0x4c2   :  { %v926_v18 = vadd.f32 %v1862_v12, %v876_v11 }
 0x4c3   :  { %v917_v14 = vpop.f32.mrf.mxu0 }
 0x4c4   :  { %v934_v24 = vmax.f32 %v926_v18, 0.0  ;;  %v918_v25 = vadd.f32 %v917_v14, %v868_v20  ;;  %v1646_v20 = vld [vmem:[#allocation13 + $0x1] ss:$0 sm:$0xff] }
 0x4c5   :  { %v1863_v19 = vpop.f32.mrf.mxu0 }
 0x4c6   :  { %v929_v22 = vadd.f32 %v1863_v19, %v879_v15  ;;  %v932_v30 = vmax.f32 %v918_v25, 0.0  ;;  %v1645_v15 = vld [vmem:[#allocation11 + $0x1] ss:$0 sm:$0xff] }
 0x4c7   :  { %v920_v23 = vpop.f32.mrf.mxu0 }
 0x4c8   :  { %v935_v26 = vmax.f32 %v929_v22, 0.0  ;;  %v921_v27 = vadd.f32 %v920_v23, %v871_v21 }
 0x4ca   :  { %v937_v28 = vpack.c.bf16 %v935_v26, %v934_v24  ;;  %v933_v29 = vmax.f32 %v921_v27, 0.0 }
 0x4cc   :  { %1865 = vmatpush3.bf16.msra.mxu0 %v937_v28  ;;  %v936_v31 = vpack.c.bf16 %v933_v29, %v932_v30  ;;  %v2033_v28 = vld [vmem:[%s2635_s12 + $0x38] sm:$0xff]   ;;  %v2034_v29 = vld [vmem:[%s2635_s12 + $0x30] sm:$0xff]   ;;  %v2035_v30 = vld [vmem:[%s2635_s12 + $0x28] sm:$0xff]  }
 0x4cd   :  { %1866 = vmatprep.subr.bf16.mxu0 %v2303_v17 }
 0x4d0   :  { %1867 = vmatpush3.bf16.msra.mxu0 %v936_v31  ;;  %v2036_v31 = vld [vmem:[%s2635_s12 + $0x20] sm:$0xff]  }
 0x4d1   :  { %1892 = vmatprep.subr.bf16.mxu0 %v2303_v17 }
 0x4d3   :  { %1869 = vmatmul.mubr.msk.bf16.vlgmr.msra.gmra.mxu0 %vm439_vm2, %v2490_v41 }
 0x4d4   :  { %1908 = vmatprep.mubr.msk.bf16.mxu0 %vm2304_vm1, %v2303_v17  ;;  %1893 = vmatpush3.bf16.msra.mxu0 %v2025_v40 }
 0x4d5   :  { %1894 = vmatprep.subr.bf16.mxu0 %v2303_v17 }
 0x4d8   :  { %1895 = vmatpush3.bf16.msra.mxu0 %v2026_v42 }
 0x4d9   :  { %1896 = vmatprep.subr.bf16.mxu0 %v2303_v17 }
 0x4dc   :  { %1897 = vmatpush3.bf16.msra.mxu0 %v2027_v43 }
 0x4dd   :  { %1898 = vmatprep.subr.bf16.mxu0 %v2303_v17 }
 0x4e0   :  { %1899 = vmatpush3.bf16.msra.mxu0 %v2028_v44  ;;  %v1261_v44 = vld [vmem:[%s2626_s3] sm:$0x3] }
 0x4e1   :  { %1900 = vmatprep.subr.bf16.mxu0 %v2303_v17 }
 0x4e4   :  { %1901 = vmatpush3.bf16.msra.mxu0 %v2029_v45  ;;  %v2040_v45 = vld [vmem:[%s2635_s12] sm:$0xff]  }
 0x4e5   :  { %1902 = vmatprep.subr.bf16.mxu0 %v2303_v17 }
 0x4e8   :  { %1903 = vmatpush3.bf16.msra.mxu0 %v2030_v46  ;;  %v2041_v46 = vld [vmem:[#allocation17 + $0x38] sm:$0xff]  }
 0x4e9   :  { %1904 = vmatprep.subr.bf16.mxu0 %v2303_v17 }
 0x4ec   :  { %1905 = vmatpush3.bf16.msra.mxu0 %v2031_v47  ;;  %v2042_v47 = vld [vmem:[#allocation17 + $0x30] sm:$0xff]  }
 0x4ed   :  { %1906 = vmatprep.subr.bf16.mxu0 %v2303_v17 }
 0x4f0   :  { %1907 = vmatpush3.bf16.msra.mxu0 %v2032_v48  ;;  %v2043_v48 = vld [vmem:[#allocation17 + $0x28] sm:$0xff]  }
 0x4f1   :  { %1919 = vmatprep.subr.bf16.mxu0 %v2303_v17 }
 0x593   :  { %v972_v34 = vpop.f32.mrf.mxu0 }
 0x594   :  { %v979_v37 = vadd.f32 %v972_v34, %v758_v7  ;;  %v2039_v34 = vld [vmem:[%s2635_s12 + $0x8] sm:$0xff]  }
 0x595   :  { %v1870_v35 = vpop.f32.mrf.mxu0 }
 0x597   :  { %v975_v36 = vpop.f32.mrf.mxu0 }
 0x598   :  { %v980_v41 = vadd.f32 %v975_v36, %v759_v63  ;;  %v1647_v36 = vld [vmem:[#allocation16 + $0x1] ss:$0 sm:$0xff] }
 0x599   :  { %v1871_v38 = vpop.f32.mrf.mxu0 }
 0x59a   :  { %v981_v39 = vpack.c.bf16 %v980_v41, %v979_v37 }
 0x59c   :  { %1889 = vmatmul.mubr.bf16.vlgmr.msra.gmra.mxu1 %v981_v39 }
 0x59d   :  { %1916 = vmatprep.mubr.msk.f32.mxu1 %vm2304_vm1, %v2303_v17 }
 0x65c   :  { %v1089_v50 = vpop.f32.mrf.mxu1 }
 0x65d   :  { %v1090_v52 = vadd.f32 %v1636_v49, %v1089_v50  ;;  %v2045_v50 = vld [vmem:[#allocation17 + $0x18] sm:$0xff]  }
 0x65e   :  { %v1890_v51 = vpop.f32.mrf.mxu1 }
 0x65f   :  { %v1104_v56 = vmul.f32 %v1090_v52, %v1090_v52  ;;  %v2046_v51 = vld [vmem:[#allocation17 + $0x10] sm:$0xff]  }
 0x660   :  { %v1092_v53 = vpop.f32.mrf.mxu1 }
 0x661   :  { %v1093_v54 = vadd.f32 %v1636_v49, %v1092_v53  ;;  %v2044_v49 = vld [vmem:[#allocation17 + $0x20] sm:$0xff]  }
 0x662   :  { %v1891_v55 = vpop.f32.mrf.mxu1 }
 0x663   :  { %v1096_v57 = vadd.f32 %v1093_v54, %v1090_v52  ;;  %v1105_v58 = vmul.f32 %v1093_v54, %v1093_v54  ;;  %v2047_v55 = vld [vmem:[#allocation17 + $0x8] sm:$0xff]  }
 0x665   :  { %v1097_v59 = vrot.slane %v1096_v57, 4  ;;  %v1106_v60 = vadd.f32 %v1105_v58, %v1104_v56  ;;  %v2048_v56 = vld [vmem:[#allocation17] sm:$0xff]  }
 0x667   :  { %v1098_v61 = vadd.f32 %v1097_v59, %v1096_v57  ;;  %v1107_v62 = vrot.slane %v1106_v60, 4  ;;  %v1657_v57 = vld [vmem:[%s2636_s13] ss:$0 sm:$0xff]  ;;  %s2253_s13 = scalar_lea.vmem %s1568_s0, 32 }
 0x668   :  { %p2254_p8 = scmp.ne.s32.totalorder %s1568_s0, %s2253_s13  ;;  %p2259_p10 = scmp.lt.s32.totalorder %s2253_s13, %s2253_s13 }
 0x669   :  { %v1099_v7 = vrot.slane %v1098_v61, 2  ;;  %v1108_v63 = vadd.f32 %v1107_v62, %v1106_v60 }
 0x66a   :  { %p2260_p11 = por %p2259_p10, %p2258_p9 }
 0x66b   :  { %v1100_v16 = vadd.f32 %v1099_v7, %v1098_v61  ;;  %v1109_v0 = vrot.slane %v1108_v63, 2 }
 0x66c   :  { %p2261_p12 = pnand %p2260_p11, %p2254_p8 }
 0x66d   :  { %v1101_v1 = vrot.slane %v1100_v16, 1  ;;  %v1110_v2 = vadd.f32 %v1109_v0, %v1108_v63 }
 0x66f   :  { %v1102_v3 = vadd.f32 %v1101_v1, %v1100_v16  ;;  %v1111_v4 = vrot.slane %v1110_v2, 1  ;;  %v1666_v16 = vld [vmem:[%s2638_s15] ss:$0 sm:$0xff] }
 0x671   :  { %v1103_v8 = vmul.f32 0.0625, %v1102_v3  ;;  %v1112_v5 = vadd.f32 %v1111_v4, %v1110_v2 }
 0x673   :  { %v1113_v6 = vmul.f32 0.0625, %v1112_v5  ;;  %v1114_v9 = vmul.f32 %v1103_v8, %v1103_v8  ;;  %v1116_v12 = vsub.f32 %v1090_v52, %v1103_v8  ;;  %v1117_v13 = vsub.f32 %v1093_v54, %v1103_v8 }
 0x675   :  { %v1115_v10 = vsub.f32 %v1113_v6, %v1114_v9 }
 0x677   :  { %v1118_v11 = vadd.f32 1e-05, %v1115_v10 }
 0x679   :  { %2051 = vrsqrt.f32 %v1118_v11 }
 0x686   :  { %v2052_v14 = vpop.eup %2051 }
 0x687   :  { %v1120_v18 = vmul.f32 %v2052_v14, %v1116_v12  ;;  %v1121_v19 = vmul.f32 %v2052_v14, %v1117_v13 }
 0x689   :  { %v1130_v21 = vmul.f32 %v1645_v15, %v1120_v18  ;;  %v1131_v22 = vmul.f32 %v1645_v15, %v1121_v19 }
 0x68b   :  { %v1140_v23 = vadd.f32 %v1646_v20, %v1130_v21  ;;  %v1141_v24 = vadd.f32 %v1646_v20, %v1131_v22 }
 0x68d   :  { %v1142_v25 = vmax.f32 %v1140_v23, 0.0  ;;  %v1143_v26 = vmax.f32 %v1141_v24, 0.0 }
 0x68f   :  { %v1144_v27 = vpack.c.bf16 %v1143_v26, %v1142_v25 }
 0x691   :  { %1909 = vmatmul.mubr.bf16.vlgmr.msra.gmra.mxu0 %v1144_v27 }
 0x692   :  { %1935 = vmatprep.mubr.msk.bf16.mxu0 %vm2304_vm1, %v2303_v17  ;;  %1920 = vmatpush3.bf16.msra.mxu0 %v2033_v28 }
 0x693   :  { %1921 = vmatprep.subr.bf16.mxu0 %v2303_v17 }
 0x696   :  { %1922 = vmatpush3.bf16.msra.mxu0 %v2034_v29 }
 0x697   :  { %1923 = vmatprep.subr.bf16.mxu0 %v2303_v17 }
 0x69a   :  { %1924 = vmatpush3.bf16.msra.mxu0 %v2035_v30 }
 0x69b   :  { %1925 = vmatprep.subr.bf16.mxu0 %v2303_v17 }
 0x69e   :  { %1926 = vmatpush3.bf16.msra.mxu0 %v2036_v31 }
 0x69f   :  { %1927 = vmatprep.subr.bf16.mxu0 %v2303_v17 }
 0x6a2   :  { %1928 = vmatpush3.bf16.msra.mxu0 %v2037_v32 }
 0x6a3   :  { %1929 = vmatprep.subr.bf16.mxu0 %v2303_v17 }
 0x6a6   :  { %1930 = vmatpush3.bf16.msra.mxu0 %v2038_v33 }
 0x6a7   :  { %1931 = vmatprep.subr.bf16.mxu0 %v2303_v17 }
 0x6aa   :  { %1932 = vmatpush3.bf16.msra.mxu0 %v2039_v34 }
 0x6ab   :  { %1933 = vmatprep.subr.bf16.mxu0 %v2303_v17 }
 0x6ae   :  { %1934 = vmatpush3.bf16.msra.mxu0 %v2040_v45 }
 0x751   :  { %v1252_v35 = vpop.f32.mrf.mxu0 }
 0x752   :  { %v1253_v38 = vadd.f32 %v1647_v36, %v1252_v35 }
 0x753   :  { %v1910_v37 = vpop.f32.mrf.mxu0 }
 0x754   :  { %v1259_v43 = vmax.f32 %v1253_v38, 0.0 }
 0x755   :  { %v1255_v41 = vpop.f32.mrf.mxu0 }
 0x756   :  { %v1256_v39 = vadd.f32 %v1647_v36, %v1255_v41 }
 0x757   :  { %v1911_v40 = vpop.f32.mrf.mxu0 }
 0x758   :  { %v1260_v42 = vmax.f32 %v1256_v39, 0.0 }
 0x75a   :  { %1913 = vmatpush3.msra.mxu1 %v1260_v42 }
 0x75b   :  { %1914 = vmatprep.subr.mxu1 %v2303_v17 }
 0x75c   :  { %1915 = vmatpush3.msra.mxu1 %v1259_v43 }
 0x75d   :  { %1917 = vmatmul.mubr.msk.f32.vlgmr.msra.gmra.mxu1 %vm349_vm0, %v1261_v44  ;;  %1939 = vmatprep.subr.bf16.mxu1 %v2303_v17 }
 0x75e   :  { %1955 = vmatprep.mubr.msk.bf16.mxu1 %vm2304_vm1, %v2303_v17  ;;  %1940 = vmatpush3.bf16.msra.mxu1 %v2041_v46 }
 0x75f   :  { %1941 = vmatprep.subr.bf16.mxu1 %v2303_v17 }
 0x762   :  { %1942 = vmatpush3.bf16.msra.mxu1 %v2042_v47 }
 0x763   :  { %1943 = vmatprep.subr.bf16.mxu1 %v2303_v17 }
 0x766   :  { %1944 = vmatpush3.bf16.msra.mxu1 %v2043_v48 }
 0x767   :  { %1945 = vmatprep.subr.bf16.mxu1 %v2303_v17 }
 0x76a   :  { %1946 = vmatpush3.bf16.msra.mxu1 %v2044_v49 }
 0x76b   :  { %1947 = vmatprep.subr.bf16.mxu1 %v2303_v17 }
 0x76e   :  { %1948 = vmatpush3.bf16.msra.mxu1 %v2045_v50 }
 0x76f   :  { %1949 = vmatprep.subr.bf16.mxu1 %v2303_v17 }
 0x772   :  { %1950 = vmatpush3.bf16.msra.mxu1 %v2046_v51 }
 0x773   :  { %1951 = vmatprep.subr.bf16.mxu1 %v2303_v17 }
 0x776   :  { %1952 = vmatpush3.bf16.msra.mxu1 %v2047_v55 }
 0x777   :  { %1953 = vmatprep.subr.bf16.mxu1 %v2303_v17 }
 0x77a   :  { %1954 = vmatpush3.bf16.msra.mxu1 %v2048_v56 }
 0x81d   :  { %v1331_v52 = vpop.f32.mrf.mxu1 }
 0x81e   :  { %v1335_v53 = vpack.c.bf16 %v1331_v52, %v1331_v52 }
 0x81f   :  { %v1918_v54 = vpop.f32.mrf.mxu1 }
 0x820   :  { %1936 = vmatmul.mubr.bf16.vlgmr.msra.gmra.mxu0 %v1335_v53 }
 0x8e0   :  { %v1441_v58 = vpop.f32.mrf.mxu0 }
 0x8e1   :  { %v1442_v59 = vadd.f32 %v1657_v57, %v1441_v58 }
 0x8e2   :  { %v1937_v60 = vpop.f32.mrf.mxu0 }
 0x8e3   :  { %v1447_v61 = vmax.f32 %v1442_v59, 0.0 }
 0x8e4   :  { %v1444_v62 = vpop.f32.mrf.mxu0 }
 0x8e5   :  { %v1448_v7 = vpack.c.bf16 %v1447_v61, %v1447_v61 }
 0x8e6   :  { %v1938_v63 = vpop.f32.mrf.mxu0 }
 0x8e7   :  { %1956 = vmatmul.mubr.bf16.vlgmr.msra.gmra.mxu1 %v1448_v7 }
 0x9a7   :  { %v1554_v17 = vpop.f32.mrf.mxu1 }
 0x9a8   :  { %v1555_v0 = vadd.f32 %v1666_v16, %v1554_v17 }
 0x9a9   :  { %v1957_v1 = vpop.f32.mrf.mxu1 }
 0x9aa   :  { %1560 = vst [vmem:[#allocation19] sm:$0x3] %v1555_v0 }
 0x9ab   :  { %v1557_v2 = vpop.f32.mrf.mxu1 }
 0x9ac   :  { %2264 = shalt.err (!%p2261_p12)
}
 0x9ad   :  { %1570 = dma.vmem_to_hbm [thread:$0]  %s1568_s0, 32, %s2639_s16, [#allocation4]   ;;  %v1958_v3 = vpop.f32.mrf.mxu1 }
 0x9ae   :  { %2285 = dma.done.wait [#allocation4], 32  }
 0x9af   :  { %2286 = vsyncadd [#allocation4], 4294967264 }
 0x9b0   :  { %1574 = vsyncpa [#allocation3], 1 }
 0x9b1   :  { %1575 = vsyncpa [#allocation6], 1 }
 0x9b2   :  { %1576 = vsyncpa [#allocation9], 1 }
 0x9b3   :  { %1577 = vsyncpa [#allocation12], 1 }
 0x9b4   :  { %1578 = vsyncpa [#allocation15], 1 }
 0x9b5   :  { %1579 = vsyncpa [#allocation18], 1 }
 0x9b6   :  { %1580 = vsyncpa [#allocation4], 1 }

</bundles_post_ra>
